<compile_context>
chip_gen: v6e
topology: v6e:2x2x1
jax: 0.10.0
libtpu: 0.0.40
codegen_flags: <defaults>
</compile_context>

<pallas_src>
import functools

import jax
import jax.numpy as jnp
from jax.experimental import pallas as pl
from jax.experimental.pallas import tpu as pltpu


def _round_up(a: int, b: int) -> int:
    return ((a + b - 1) // b) * b


def _sublane(dtype) -> int:
    # 8 rows/f32, 16 rows/bf16, 32 rows/int8-fp8 per packed sublane group.
    return max(8, 32 // jnp.dtype(dtype).itemsize)


def expert_kernel(x_ref, w1g_ref, w2_ref, o_ref, acc_ref):
    """One (token-tile, H-block) step of the SwiGLU expert FFN.

    x_ref:   (TM, E)      token tile (compute dtype)
    w1g_ref: (E,  2*TH)   fused [W1.T | Wg.T] H-block
    w2_ref:  (TH, E)      W2.T H-block
    o_ref:   (TM, E)      output tile (written on last H step)
    acc_ref: (TM, E) f32  down-projection accumulator
    """
    th = w2_ref.shape[0]
    hstep = pl.program_id(1)

    @pl.when(hstep == 0)
    def _():
        acc_ref[...] = jnp.zeros_like(acc_ref)

    # Fused up + gate projection on the MXU, f32 accumulation.
    h12 = jnp.dot(x_ref[...], w1g_ref[...], preferred_element_type=jnp.float32)
    h1 = h12[:, :th]            # lin1(x) block   (lane-aligned: th % 128 == 0)
    hg = h12[:, th:]            # lin_gate(x) block

    # SiLU epilogue in f32: exp + approx reciprocal both run on the EUP slot
    # (free filler while the MXU is busy).
    sig = pl.reciprocal(1.0 + jnp.exp(-h1), approx=True)
    hidden = (h1 * sig) * hg

    # Down projection for this H-block, accumulated in f32.
    acc_ref[...] += jnp.dot(hidden.astype(w2_ref.dtype), w2_ref[...],
                            preferred_element_type=jnp.float32)

    @pl.when(hstep == pl.num_programs(1) - 1)
    def _():
        o_ref[...] = acc_ref[...].astype(o_ref.dtype)


def prepare_expert_weights(w1, wg, w2, compute_dtype=jnp.bfloat16,
                           weight_vmem_budget=12 * 1024 * 1024):
    """One-time weight prep (call at weight-load time, NOT per forward).

    w1, wg: [H, E] (PyTorch nn.Linear layout), w2: [E, H].
    Returns
      w1g: [n_h, E, 2*th]  per-H-block fused [W1.T | Wg.T]
      w2t: [n_h, th, E]    per-H-block W2.T
    in `compute_dtype` (bf16 by default; pass jnp.float32 only for debugging).
    H is zero-padded to a multiple of the H block (itself a multiple of 128)
    so the in-kernel h1/hg split is lane aligned; the pad is an exact no-op.
    """
    H, E = w1.shape
    assert wg.shape == (H, E) and w2.shape == (E, H)
    itemsize = jnp.dtype(compute_dtype).itemsize

    # Per-buffer fused weight bytes for an H block of size th:
    #   E*2*th (w1g) + th*E (w2t) = 3*E*th*itemsize.
    th_cap = max(128, ((weight_vmem_budget // (3 * E * itemsize)) // 128) * 128)
    th = min(_round_up(H, 128), th_cap)
    Hp = _round_up(H, th)
    n_h = Hp // th

    pad = Hp - H
    w1t = jnp.pad(w1.T, ((0, 0), (0, pad)))       # [E, Hp]
    wgt = jnp.pad(wg.T, ((0, 0), (0, pad)))       # [E, Hp]
    w2t = jnp.pad(w2.T, ((0, pad), (0, 0)))       # [Hp, E]

    # Interleave per H-block: block k holds [W1.T block k | Wg.T block k].
    w1g = jnp.concatenate(
        [w1t.reshape(E, n_h, th), wgt.reshape(E, n_h, th)], axis=-1)   # [E, n_h, 2*th]
    w1g = jnp.transpose(w1g, (1, 0, 2)).astype(compute_dtype)          # [n_h, E, 2*th]
    w2t = w2t.reshape(n_h, th, E).astype(compute_dtype)                # [n_h, th, E]
    return w1g, w2t


def _resident_spec(block_shape, index_map):
    """BlockSpec for a constant-index (resident) weight block, single-buffered."""
    try:
        return pl.BlockSpec(block_shape, index_map, pipeline_mode=pl.Buffered(1))
    except Exception:
        return pl.BlockSpec(block_shape, index_map)


@functools.partial(jax.jit, static_argnames=("tm",))
def expert_forward(x, w1g, w2t, *, tm=512):
    """x: [..., E].  w1g: [n_h, E, 2*th] fused up/gate weight.  w2t: [n_h, th, E]."""
    orig_shape = x.shape
    E = x.shape[-1]
    n_h, th = w2t.shape[0], w2t.shape[1]
    assert w1g.shape == (n_h, E, 2 * th) and w2t.shape == (n_h, th, E)

    out_dtype = x.dtype
    cdt = w1g.dtype                        # compute dtype follows the weights
    x2d = x.reshape(-1, E).astype(cdt)
    N = x2d.shape[0]

    # Token tile: dtype-correct sublane multiple, capped by the token count.
    sub = _sublane(cdt)
    tm_eff = _round_up(min(tm, _round_up(N, sub)), sub)
    # Prefill-sized calls: ensure >=2 token blocks so v7x's two TensorCores
    # both get work (one extra ~0.35us grid step elsewhere is negligible).
    if N >= 256 and pl.cdiv(N, tm_eff) < 2:
        tm_eff = _round_up(pl.cdiv(N, 2), sub)

    # No padding on the main path: Pallas handles the partial final block.
    if tm_eff > N:   # tiny-N fallback only (N smaller than one sublane tile)
        x2d = jnp.pad(x2d, ((0, tm_eff - N), (0, 0)))
        Np = tm_eff
    else:
        Np = N
    n_blocks = pl.cdiv(Np, tm_eff)

    in_item = jnp.dtype(cdt).itemsize
    out_item = jnp.dtype(out_dtype).itemsize
    resident = (n_h == 1)

    # VMEM demand: double-buffered x/out tiles, weight blocks (single buffer
    # when resident), f32 accumulator; +50% and +2 MiB slack for Mosaic
    # internals.  Never request the whole physical VMEM (v7x: 64 MiB/TC).
    w_bufs = 1 if resident else 2
    vmem_needed = (2 * tm_eff * E * in_item
                   + 2 * tm_eff * E * out_item
                   + w_bufs * 3 * E * th * in_item
                   + tm_eff * E * 4)
    vmem_limit = max(16 << 20, min(int(vmem_needed * 1.5) + (2 << 20), 48 << 20))

    weight_reads = 1 if resident else n_blocks
    cost = pl.CostEstimate(
        flops=2 * N * E * (2 * n_h * th) + 2 * N * (n_h * th) * E,
        transcendentals=N * n_h * th,                  # exp in SiLU
        bytes_accessed=(N * E * in_item                # x
                        + N * E * out_item             # out
                        + weight_reads * 3 * E * n_h * th * in_item),  # weights
    )

    if resident:
        w1g_spec = _resident_spec((None, E, 2 * th), lambda i, h: (h, 0, 0))
        w2t_spec = _resident_spec((None, th, E), lambda i, h: (h, 0, 0))
    else:
        w1g_spec = pl.BlockSpec((None, E, 2 * th), lambda i, h: (h, 0, 0))
        w2t_spec = pl.BlockSpec((None, th, E), lambda i, h: (h, 0, 0))

    out = pl.pallas_call(
        expert_kernel,
        out_shape=jax.ShapeDtypeStruct((Np, E), out_dtype),
        grid_spec=pltpu.PrefetchScalarGridSpec(
            num_scalar_prefetch=0,
            grid=(n_blocks, n_h),
            in_specs=[
                pl.BlockSpec((tm_eff, E), lambda i, h: (i, 0)),   # x tile
                w1g_spec,                                         # fused W1|Wg block
                w2t_spec,                                         # W2.T block
            ],
            out_specs=pl.BlockSpec((tm_eff, E), lambda i, h: (i, 0)),
            scratch_shapes=[pltpu.VMEM((tm_eff, E), jnp.float32)],
        ),
        compiler_params=pltpu.CompilerParams(
            dimension_semantics=("parallel", "arbitrary"),
            vmem_limit_bytes=vmem_limit,
        ),
        cost_estimate=cost,
    )(x2d, w1g, w2t)

    if Np != N:
        out = out[:N]
    return out.reshape(orig_shape)


def expert_reference(x, w1, wg, w2):
    """Pure-JAX reference matching the PyTorch forward exactly."""
    x1 = x @ w1.T
    x1 = x1 * jax.nn.sigmoid(x1)
    x2 = x @ wg.T
    return (x1 * x2) @ w2.T


if __name__ == "__main__":
    # cfg = {"emb_dim": 128, "hidden_dim": 512, "dtype": float32}, scaling_factor = 0.5
    emb_dim = 128
    hidden_dim = 512
    scaling_factor = 0.5
    hid = int(scaling_factor * hidden_dim)   # 256
    dtype = jnp.float32

    batch, seq = 2, 8

    key = jax.random.PRNGKey(0)
    kx, k1, kg, k2 = jax.random.split(key, 4)

    # Deterministic parameter init (PyTorch nn.Linear weight shapes: [out, in]).
    x = jax.random.normal(kx, (batch, seq, emb_dim), dtype=dtype)
    w1 = jax.random.normal(k1, (hid, emb_dim), dtype=dtype) * 0.02
    wg = jax.random.normal(kg, (hid, emb_dim), dtype=dtype) * 0.02
    w2 = jax.random.normal(k2, (emb_dim, hid), dtype=dtype) * 0.02

    ref = expert_reference(x.reshape(-1, emb_dim), w1, wg, w2)
    ref = ref.reshape(batch, seq, emb_dim)

    # ---- default path: bf16 operands, f32 accumulation / f32 epilogue ------
    w1g_bf, w2t_bf = prepare_expert_weights(w1, wg, w2)            # once, at load time
    out_bf = expert_forward(x, w1g_bf, w2t_bf)
    jax.block_until_ready(out_bf)
    assert out_bf.shape == (batch, seq, emb_dim)
    assert out_bf.dtype == dtype
    assert jnp.allclose(out_bf, ref, atol=5e-3, rtol=5e-2), "bf16 mismatch vs reference"

    # ---- f32-operand debug path --------------------------------------------
    w1g_f32, w2t_f32 = prepare_expert_weights(w1, wg, w2, compute_dtype=jnp.float32)
    out_f32 = expert_forward(x, w1g_f32, w2t_f32)
    jax.block_until_ready(out_f32)
    assert jnp.allclose(out_f32, ref, atol=1e-3, rtol=1e-3), "f32 mismatch vs reference"

    print("KERNEL_OK")
</pallas_src>

<mosaic_0001>
module attributes {stable_mosaic.version = 11 : i64} {
  func.func @expert_kernel(%arg0: i32, %arg1: i32, %arg2: memref<16x128xbf16, #tpu.memory_space<vmem>>, %arg3: memref<1x128x512xbf16, #tpu.memory_space<vmem>>, %arg4: memref<1x256x128xbf16, #tpu.memory_space<vmem>>, %arg5: memref<16x128xf32, #tpu.memory_space<vmem>>, %arg6: memref<16x128xf32, #tpu.memory_space<vmem>>) attributes {dimension_semantics = [#tpu.dimension_semantics<parallel>, #tpu.dimension_semantics<arbitrary>], iteration_bounds = array<i64: 1, 1>, scalar_prefetch = 0 : i64, scratch_operands = 1 : i64, tpu.core_type = #tpu.core_type<tc>, window_params = [{transform_indices = @transform_0, window_bounds = array<i64: 16, 128>}, {pipeline_mode = #tpu.pipeline_mode<synchronous>, transform_indices = @transform_1, window_bounds = array<i64: 1, 128, 512>}, {pipeline_mode = #tpu.pipeline_mode<synchronous>, transform_indices = @transform_2, window_bounds = array<i64: 1, 256, 128>}, {transform_indices = @transform_3, window_bounds = array<i64: 16, 128>}]} {
    %c0_i32 = arith.constant 0 : i32
    %0 = arith.cmpi eq, %arg1, %c0_i32 : i32
    %1 = arith.extui %0 : i1 to i32
    %c0_i32_0 = arith.constant 0 : i32
    %2 = arith.cmpi ne, %1, %c0_i32_0 : i32
    scf.if %2 {
      %cst_17 = arith.constant 0.000000e+00 : f32
      %27 = vector.broadcast %cst_17 : f32 to vector<16x128xf32>
      %c0_18 = arith.constant 0 : index
      %c0_19 = arith.constant 0 : index
      %28 = vector.load %arg6[%c0_18, %c0_19] : memref<16x128xf32, #tpu.memory_space<vmem>>, vector<16x128xf32>
      tpu.vector_store %arg6[%c0_18, %c0_19], %27 {strides = array<i32>} : memref<16x128xf32, #tpu.memory_space<vmem>>, vector<16x128xf32>,
    } else {
    }
    %c0 = arith.constant 0 : index
    %c0_1 = arith.constant 0 : index
    %3 = vector.load %arg2[%c0, %c0_1] : memref<16x128xbf16, #tpu.memory_space<vmem>>, vector<16x128xbf16>
    %c0_2 = arith.constant 0 : index
    %c0_3 = arith.constant 0 : index
    %c0_4 = arith.constant 0 : index
    %4 = vector.load %arg3[%c0_2, %c0_3, %c0_4] : memref<1x128x512xbf16, #tpu.memory_space<vmem>>, vector<1x128x512xbf16>
    %5 = vector.shape_cast %4 : vector<1x128x512xbf16> to vector<128x512xbf16>
    %cst = arith.constant dense<0.000000e+00> : vector<16x512xf32>
    %6 = tpu.matmul %3, %5, %cst {dimension_numbers = #tpu.dot_dimension_numbers<[1], [0], [0], [1], [0, 0, 1, 1], [], []>} : vector<16x128xbf16>, vector<128x512xbf16>, vector<16x512xf32> -> vector<16x512xf32>
    %7 = vector.extract_strided_slice %6 {offsets = [0, 0], sizes = [16, 256], strides = [1, 1]} : vector<16x512xf32> to vector<16x256xf32>
    %8 = vector.extract_strided_slice %6 {offsets = [0, 256], sizes = [16, 256], strides = [1, 1]} : vector<16x512xf32> to vector<16x256xf32>
    %cst_5 = arith.constant 0.000000e+00 : f32
    %9 = vector.broadcast %cst_5 : f32 to vector<16x256xf32>
    %10 = arith.subf %9, %7 : vector<16x256xf32>
    %11 = math.exp %10 : vector<16x256xf32>
    %cst_6 = arith.constant 1.000000e+00 : f32
    %12 = vector.broadcast %cst_6 : f32 to vector<16x256xf32>
    %13 = arith.addf %12, %11 : vector<16x256xf32>
    %14 = tpu.reciprocal %13 {approx = true} : vector<16x256xf32> -> vector<16x256xf32>
    %15 = arith.mulf %7, %14 : vector<16x256xf32>
    %16 = arith.mulf %15, %8 : vector<16x256xf32>
    %c0_7 = arith.constant 0 : index
    %c0_8 = arith.constant 0 : index
    %17 = vector.load %arg6[%c0_7, %c0_8] : memref<16x128xf32, #tpu.memory_space<vmem>>, vector<16x128xf32>
    %18 = arith.truncf %16 : vector<16x256xf32> to vector<16x256xbf16>
    %c0_9 = arith.constant 0 : index
    %c0_10 = arith.constant 0 : index
    %c0_11 = arith.constant 0 : index
    %19 = vector.load %arg4[%c0_9, %c0_10, %c0_11] : memref<1x256x128xbf16, #tpu.memory_space<vmem>>, vector<1x256x128xbf16>
    %20 = vector.shape_cast %19 : vector<1x256x128xbf16> to vector<256x128xbf16>
    %cst_12 = arith.constant dense<0.000000e+00> : vector<16x128xf32>
    %21 = tpu.matmul %18, %20, %cst_12 {dimension_numbers = #tpu.dot_dimension_numbers<[1], [0], [0], [1], [0, 0, 1, 1], [], []>} : vector<16x256xbf16>, vector<256x128xbf16>, vector<16x128xf32> -> vector<16x128xf32>
    %22 = arith.addf %17, %21 : vector<16x128xf32>
    %c0_13 = arith.constant 0 : index
    %c0_14 = arith.constant 0 : index
    %23 = vector.load %arg6[%c0_13, %c0_14] : memref<16x128xf32, #tpu.memory_space<vmem>>, vector<16x128xf32>
    tpu.vector_store %arg6[%c0_13, %c0_14], %22 {strides = array<i32>} : memref<16x128xf32, #tpu.memory_space<vmem>>, vector<16x128xf32>,
    %c0_i32_15 = arith.constant 0 : i32
    %24 = arith.cmpi eq, %arg1, %c0_i32_15 : i32
    %25 = arith.extui %24 : i1 to i32
    %c0_i32_16 = arith.constant 0 : i32
    %26 = arith.cmpi ne, %25, %c0_i32_16 : i32
    scf.if %26 {
      %c0_17 = arith.constant 0 : index
      %c0_18 = arith.constant 0 : index
      %27 = vector.load %arg6[%c0_17, %c0_18] : memref<16x128xf32, #tpu.memory_space<vmem>>, vector<16x128xf32>
      %c0_19 = arith.constant 0 : index
      %c0_20 = arith.constant 0 : index
      %28 = vector.load %arg5[%c0_19, %c0_20] : memref<16x128xf32, #tpu.memory_space<vmem>>, vector<16x128xf32>
      tpu.vector_store %arg5[%c0_19, %c0_20], %27 {strides = array<i32>} : memref<16x128xf32, #tpu.memory_space<vmem>>, vector<16x128xf32>,
    } else {
    }
    return
  }
  func.func @transform_0(%arg0: i32, %arg1: i32) -> (i32, i32) {
    %c0_i32 = arith.constant 0 : i32
    %c0_i32_0 = arith.constant 0 : i32
    return %arg0, %c0_i32 : i32, i32
  }
  func.func @transform_1(%arg0: i32, %arg1: i32) -> (i32, i32, i32) {
    %c0_i32 = arith.constant 0 : i32
    %c0_i32_0 = arith.constant 0 : i32
    %c0_i32_1 = arith.constant 0 : i32
    return %arg1, %c0_i32, %c0_i32_0 : i32, i32, i32
  }
  func.func @transform_2(%arg0: i32, %arg1: i32) -> (i32, i32, i32) {
    %c0_i32 = arith.constant 0 : i32
    %c0_i32_0 = arith.constant 0 : i32
    %c0_i32_1 = arith.constant 0 : i32
    return %arg1, %c0_i32, %c0_i32_0 : i32, i32, i32
  }
  func.func @transform_3(%arg0: i32, %arg1: i32) -> (i32, i32) {
    %c0_i32 = arith.constant 0 : i32
    %c0_i32_0 = arith.constant 0 : i32
    return %arg0, %c0_i32 : i32, i32
  }
}

</mosaic_0001>

<bundles_post_ra>
// kernel: expert_forward.1
= control target key start
LH: loop header
LB: loop body
LE: loop exit
PB: predicated region body
PF: predicated region fallthrough
CT: control target
= control target key end

     0   :  { %8 = vsyncpa [#allocation4], 0  ;;  %s836_s0 = inlined_call_operand.vmem [shape: bf16[16,128], index: 0, kind: input, shape index: {}]   ;;  %s837_s1 = inlined_call_operand.hbm [shape: bf16[1,128,512], index: 1, kind: input, shape index: {}]   ;;  %s838_s2 = inlined_call_operand.hbm [shape: bf16[1,256,128], index: 2, kind: input, shape index: {}]   ;;  %s839_s3 = inlined_call_operand.hbm [shape: f32[16,128], index: 3, kind: output, shape index: {}]  }
   0x1   :  { %9 = vsyncpa [#allocation7], 0 }
   0x2   :  { %10 = vsyncpa [#allocation5], 0  ;;  %s794_s12 = smov [#allocation3]  }
   0x3   :  { %s18_s13 = sshll.u32 %s794_s12, 4  ;;  %s19_s13 = int_to_ptr.vmem [resolvable:$true] %s18_s13 }
   0x4   :  { %s736_s14 = scalar_lea.vmem %s19_s13, 4096  ;;  %p741_p1 = scmp.lt.s32.totalorder %s19_s13, %s19_s13 }
   0x5   :  { %p737_p0 = scmp.ne.s32.totalorder %s19_s13, %s736_s14  ;;  %p742_p2 = scmp.lt.s32.totalorder %s736_s14, %s736_s14 }
   0x7   :  { %p743_p3 = por %p742_p2, %p741_p1 }
   0x9   :  { %p744_p4 = pnand %p743_p3, %p737_p0 }
   0xb   :  { %747 = shalt.err (!%p744_p4)
}
   0xc   :  { %s795_s15 = smov 256   ;;  %s796_s16 = smov 16  }
   0xd   :  { %24 = dma.hbm_to_vmem [thread:$0]  %s837_s1, 4096, %s19_s13, [#allocation4], %s795_s15, %s795_s15, %s796_s16  }
   0xe   :  { %s797_s19 = smov [#allocation6]  }
   0xf   :  { %s30_s20 = sshll.u32 %s797_s19, 4  ;;  %s31_s20 = int_to_ptr.vmem [resolvable:$true] %s30_s20 }
  0x10   :  { %s756_s21 = scalar_lea.vmem %s31_s20, 2048  ;;  %p761_p6 = scmp.lt.s32.totalorder %s31_s20, %s31_s20 }
  0x11   :  { %p757_p5 = scmp.ne.s32.totalorder %s31_s20, %s756_s21  ;;  %p762_p7 = scmp.lt.s32.totalorder %s756_s21, %s756_s21 }
  0x13   :  { %p763_p8 = por %p762_p7, %p761_p6 }
  0x15   :  { %p764_p9 = pnand %p763_p8, %p757_p5 }
  0x17   :  { %767 = shalt.err (!%p764_p9)
}
  0x18   :  { %s798_s22 = smov 64   ;;  %s799_s23 = smov 4  }
  0x19   :  { %36 = dma.hbm_to_vmem [thread:$0]  %s838_s2, 2048, %s31_s20, [#allocation7], %s798_s22, %s798_s22, %s799_s23  }
  0x1a   :  { %788 = dma.done.wait [#allocation4], 4096  }
  0x1b   :  { %789 = vsyncadd [#allocation4], 4294963200 }
  0x1c   :  { %790 = dma.done.wait [#allocation7], 2048  }
  0x1d   :  { %791 = vsyncadd [#allocation7], 4294965248  ;;  %v800_v0 = vmov 0   ;;  %v647_v1 = vld [vmem:[#allocation3 + $0xe4] ss:$16 sps:$4 sm:$0xff]   ;;  %v696_v34 = vld [vmem:[#allocation6 + $0x78] sm:$0xff]  }
  0x1e   :  { %282 = vmatprep.mubr.bf16.mxu0 %v800_v0  ;;  %325 = vmatprep.mubr.bf16.mxu1 %v800_v0  ;;  %v649_v2 = vld [vmem:[#allocation3 + $0xe0] ss:$16 sps:$4 sm:$0xff]   ;;  %v650_v3 = vld [vmem:[#allocation3 + $0xc4] ss:$16 sps:$4 sm:$0xff]   ;;  %v671_v9 = vld [vmem:[#allocation3 + $0xec] ss:$16 sps:$4 sm:$0xff]  }
  0x1f   :  { %250 = vmatprep.subr.bf16.mxu0 %v647_v1  ;;  %v652_v4 = vld [vmem:[#allocation3 + $0xc0] ss:$16 sps:$4 sm:$0xff]   ;;  %v653_v5 = vld [vmem:[#allocation3 + $0xa4] ss:$16 sps:$4 sm:$0xff]   ;;  %v673_v10 = vld [vmem:[#allocation3 + $0xe8] ss:$16 sps:$4 sm:$0xff]   ;;  %293 = vmatprep.subr.bf16.mxu1 %v671_v9 }
  0x20   :  { %251 = vmatpush1.bf16.msra.mxu0 %v649_v2  ;;  %v655_v6 = vld [vmem:[#allocation3 + $0xa0] ss:$16 sps:$4 sm:$0xff]   ;;  %v656_v7 = vld [vmem:[#allocation3 + $0x84] ss:$16 sps:$4 sm:$0xff]   ;;  %v675_v12 = vld [vmem:[#allocation3 + $0xcc] ss:$16 sps:$4 sm:$0xff]   ;;  %294 = vmatpush1.bf16.msra.mxu1 %v673_v10 }
  0x21   :  { %252 = vmatprep.subr.bf16.mxu0 %v650_v3  ;;  %v658_v8 = vld [vmem:[#allocation3 + $0x80] ss:$16 sps:$4 sm:$0xff]   ;;  %v659_v11 = vld [vmem:[#allocation3 + $0x64] ss:$16 sps:$4 sm:$0xff]   ;;  %v677_v13 = vld [vmem:[#allocation3 + $0xc8] ss:$16 sps:$4 sm:$0xff]   ;;  %295 = vmatprep.subr.bf16.mxu1 %v675_v12 }
  0x22   :  { %v661_v14 = vld [vmem:[#allocation3 + $0x60] ss:$16 sps:$4 sm:$0xff]   ;;  %v678_v15 = vld [vmem:[#allocation3 + $0xac] ss:$16 sps:$4 sm:$0xff]   ;;  %v662_v16 = vld [vmem:[#allocation3 + $0x44] ss:$16 sps:$4 sm:$0xff]  }
  0x23   :  { %v680_v17 = vld [vmem:[#allocation3 + $0xa8] ss:$16 sps:$4 sm:$0xff]   ;;  %v664_v18 = vld [vmem:[#allocation3 + $0x40] ss:$16 sps:$4 sm:$0xff]   ;;  %v681_v19 = vld [vmem:[#allocation3 + $0x8c] ss:$16 sps:$4 sm:$0xff]  }
  0x24   :  { %253 = vmatpush1.bf16.msra.mxu0 %v652_v4  ;;  %296 = vmatpush1.bf16.msra.mxu1 %v677_v13  ;;  %v665_v20 = vld [vmem:[#allocation3 + $0x24] ss:$16 sps:$4 sm:$0xff]   ;;  %v667_v21 = vld [vmem:[#allocation3 + $0x20] ss:$16 sps:$4 sm:$0xff]   ;;  %v683_v22 = vld [vmem:[#allocation3 + $0x88] ss:$16 sps:$4 sm:$0xff]  }
  0x25   :  { %254 = vmatprep.subr.bf16.mxu0 %v653_v5  ;;  %297 = vmatprep.subr.bf16.mxu1 %v678_v15  ;;  %v668_v23 = vld [vmem:[#allocation3 + $0x4] ss:$16 sps:$4 sm:$0xff]   ;;  %v684_v24 = vld [vmem:[#allocation3 + $0x6c] ss:$16 sps:$4 sm:$0xff]   ;;  %v686_v25 = vld [vmem:[#allocation3 + $0x68] ss:$16 sps:$4 sm:$0xff]  }
  0x26   :  { %v670_v26 = vld [vmem:[#allocation3] ss:$16 sps:$4 sm:$0xff]   ;;  %v687_v27 = vld [vmem:[#allocation3 + $0x4c] ss:$16 sps:$4 sm:$0xff]   ;;  %v689_v29 = vld [vmem:[#allocation3 + $0x48] ss:$16 sps:$4 sm:$0xff]  }
  0x27   :  { %v674_v28 = vld [vmem:[%s836_s0] sm:$0xff]   ;;  %v690_v30 = vld [vmem:[#allocation3 + $0x2c] ss:$16 sps:$4 sm:$0xff]   ;;  %v692_v31 = vld [vmem:[#allocation3 + $0x28] ss:$16 sps:$4 sm:$0xff]   ;;  %s801_s0 = smov [#allocation8]  }
  0x28   :  { %255 = vmatpush1.bf16.msra.mxu0 %v655_v6  ;;  %298 = vmatpush1.bf16.msra.mxu1 %v680_v17  ;;  %v693_v32 = vld [vmem:[#allocation3 + $0xc] ss:$16 sps:$4 sm:$0xff]   ;;  %v695_v33 = vld [vmem:[#allocation3 + $0x8] ss:$16 sps:$4 sm:$0xff]   ;;  %v698_v36 = vld [vmem:[#allocation6 + $0x70] sm:$0xff]   ;;  %s553_s26 = sshll.u32 %s801_s0, 4  ;;  %s554_s26 = int_to_ptr.vmem [resolvable:$true] %s553_s26 }
  0x29   :  { %256 = vmatprep.subr.bf16.mxu0 %v656_v7  ;;  %299 = vmatprep.subr.bf16.mxu1 %v681_v19  ;;  %v697_v35 = vld [vmem:[#allocation6 + $0x38] sm:$0xff]   ;;  %v699_v37 = vld [vmem:[#allocation6 + $0x30] sm:$0xff]   ;;  %v700_v38 = vld [vmem:[#allocation6 + $0x68] sm:$0xff]   ;;  %s768_s27 = scalar_lea.vmem %s554_s26, 256  ;;  %p773_p11 = scmp.lt.s32.totalorder %s554_s26, %s554_s26 }
  0x2a   :  { %v701_v39 = vld [vmem:[#allocation6 + $0x28] sm:$0xff]   ;;  %v702_v40 = vld [vmem:[#allocation6 + $0x60] sm:$0xff]   ;;  %v704_v42 = vld [vmem:[#allocation6 + $0x58] sm:$0xff]   ;;  %p769_p10 = scmp.ne.s32.totalorder %s554_s26, %s768_s27  ;;  %p774_p12 = scmp.lt.s32.totalorder %s768_s27, %s768_s27 }
  0x2b   :  { %v703_v41 = vld [vmem:[#allocation6 + $0x20] sm:$0xff]   ;;  %v705_v43 = vld [vmem:[#allocation6 + $0x18] sm:$0xff]   ;;  %v706_v44 = vld [vmem:[#allocation6 + $0x50] sm:$0xff]  }
  0x2c   :  { %257 = vmatpush1.bf16.msra.mxu0 %v658_v8  ;;  %300 = vmatpush1.bf16.msra.mxu1 %v683_v22  ;;  %v707_v45 = vld [vmem:[#allocation6 + $0x10] sm:$0xff]   ;;  %v708_v46 = vld [vmem:[#allocation6 + $0x48] sm:$0xff]   ;;  %v710_v48 = vld [vmem:[#allocation6 + $0x40] sm:$0xff]   ;;  %p775_p13 = por %p774_p12, %p773_p11 }
  0x2d   :  { %258 = vmatprep.subr.bf16.mxu0 %v659_v11  ;;  %301 = vmatprep.subr.bf16.mxu1 %v684_v24  ;;  %v709_v47 = vld [vmem:[#allocation6 + $0x8] sm:$0xff]   ;;  %v711_v49 = vld [vmem:[#allocation6] sm:$0xff]  }
  0x2e   :  { %p776_p0 = pnand %p775_p13, %p769_p10 }
  0x30   :  { %259 = vmatpush1.bf16.msra.mxu0 %v661_v14  ;;  %302 = vmatpush1.bf16.msra.mxu1 %v686_v25 }
  0x31   :  { %260 = vmatprep.subr.bf16.mxu0 %v662_v16  ;;  %303 = vmatprep.subr.bf16.mxu1 %v687_v27 }
  0x34   :  { %261 = vmatpush1.bf16.msra.mxu0 %v664_v18  ;;  %304 = vmatpush1.bf16.msra.mxu1 %v689_v29 }
  0x35   :  { %262 = vmatprep.subr.bf16.mxu0 %v665_v20  ;;  %305 = vmatprep.subr.bf16.mxu1 %v690_v30 }
  0x38   :  { %263 = vmatpush1.bf16.msra.mxu0 %v667_v21  ;;  %306 = vmatpush1.bf16.msra.mxu1 %v692_v31 }
  0x39   :  { %264 = vmatprep.subr.bf16.mxu0 %v668_v23  ;;  %307 = vmatprep.subr.bf16.mxu1 %v693_v32 }
  0x3c   :  { %265 = vmatpush1.bf16.msra.mxu0 %v670_v26  ;;  %308 = vmatpush1.bf16.msra.mxu1 %v695_v33 }
  0x3d   :  { %615 = vmatprep.subr.bf16.mxu0 %v696_v34 }
  0x3f   :  { %283 = vmatmul.mubr.bf16.vlgmr.msra.gmra.mxu0 %v674_v28  ;;  %326 = vmatmul.mubr.bf16.vlgmr.msra.gmra.mxu1 %v674_v28 }
  0x40   :  { %616 = vmatpush3.bf16.msra.mxu0 %v697_v35 }
  0x41   :  { %617 = vmatprep.subr.bf16.mxu0 %v698_v36 }
  0x44   :  { %618 = vmatpush3.bf16.msra.mxu0 %v699_v37 }
  0x45   :  { %619 = vmatprep.subr.bf16.mxu0 %v700_v38 }
  0x48   :  { %620 = vmatpush3.bf16.msra.mxu0 %v701_v39 }
  0x49   :  { %621 = vmatprep.subr.bf16.mxu0 %v702_v40 }
  0x4c   :  { %622 = vmatpush3.bf16.msra.mxu0 %v703_v41 }
  0x4d   :  { %623 = vmatprep.subr.bf16.mxu0 %v704_v42 }
  0x50   :  { %624 = vmatpush3.bf16.msra.mxu0 %v705_v43 }
  0x51   :  { %625 = vmatprep.subr.bf16.mxu0 %v706_v44 }
  0x54   :  { %626 = vmatpush3.bf16.msra.mxu0 %v707_v45 }
  0x55   :  { %627 = vmatprep.subr.bf16.mxu0 %v708_v46 }
  0x58   :  { %628 = vmatpush3.bf16.msra.mxu0 %v709_v47 }
  0x59   :  { %629 = vmatprep.subr.bf16.mxu0 %v710_v48 }
  0x5c   :  { %630 = vmatpush3.bf16.msra.mxu0 %v711_v49 }
  0xff   :  { %v284_v50 = vpop.f32.mrf.mxu0  ;;  %v327_v6 = vpop.f32.mrf.mxu1 }
 0x100   :  { %v336_v51 = vsub.f32 0.0, %v284_v50 }
 0x101   :  { %v286_v52 = vpop.f32.mrf.mxu0  ;;  %v329_v7 = vpop.f32.mrf.mxu1 }
 0x102   :  { %v340_v53 = vmul.f32 1.442695, %v336_v51  ;;  %v337_v54 = vsub.f32 0.0, %v286_v52 }
 0x103   :  { %v288_v55 = vpop.f32.mrf.mxu0  ;;  %v331_v11 = vpop.f32.mrf.mxu1 }
 0x104   :  { %712 = vpow2.f32 %v340_v53  ;;  %v342_v56 = vmul.f32 1.442695, %v337_v54  ;;  %v338_v57 = vsub.f32 0.0, %v288_v55 }
 0x105   :  { %v290_v58 = vpop.f32.mrf.mxu0  ;;  %v333_v18 = vpop.f32.mrf.mxu1 }
 0x106   :  { %714 = vpow2.f32 %v342_v56  ;;  %v344_v59 = vmul.f32 1.442695, %v338_v57  ;;  %v339_v60 = vsub.f32 0.0, %v290_v58 }
 0x108   :  { %716 = vpow2.f32 %v344_v59  ;;  %v346_v61 = vmul.f32 1.442695, %v339_v60 }
 0x10a   :  { %718 = vpow2.f32 %v346_v61 }
 0x111   :  { %v713_v62 = vpop.eup %712 }
 0x112   :  { %v348_v0 = vadd.f32 1.0, %v713_v62 }
 0x113   :  { %v715_v63 = vpop.eup %714 }
 0x114   :  { %v349_v1 = vadd.f32 1.0, %v715_v63 }
 0x115   :  { %v717_v2 = vpop.eup %716 }
 0x116   :  { %720 = vrcp.f32 %v349_v1  ;;  %v350_v3 = vadd.f32 1.0, %v717_v2 }
 0x117   :  { %v719_v4 = vpop.eup %718  ;;  %722 = vrcp.f32 %v348_v0 }
 0x118   :  { %724 = vrcp.f32 %v350_v3  ;;  %v351_v5 = vadd.f32 1.0, %v719_v4 }
 0x11a   :  { %726 = vrcp.f32 %v351_v5 }
 0x123   :  { %v721_v8 = vpop.eup %720 }
 0x124   :  { %v723_v9 = vpop.eup %722  ;;  %v357_v12 = vmul.f32 %v721_v8, %v286_v52 }
 0x125   :  { %v725_v10 = vpop.eup %724  ;;  %v356_v15 = vmul.f32 %v723_v9, %v284_v50 }
 0x126   :  { %v358_v13 = vmul.f32 %v725_v10, %v288_v55  ;;  %v361_v19 = vmul.f32 %v357_v12, %v329_v7 }
 0x127   :  { %v727_v14 = vpop.eup %726  ;;  %v360_v21 = vmul.f32 %v356_v15, %v327_v6 }
 0x128   :  { %v359_v16 = vmul.f32 %v727_v14, %v290_v58  ;;  %v362_v17 = vmul.f32 %v358_v13, %v331_v11 }
 0x12a   :  { %v363_v20 = vmul.f32 %v359_v16, %v333_v18  ;;  %v366_v23 = vpack.c.bf16 %v362_v17, %v360_v21 }
 0x12c   :  { %v367_v22 = vpack.c.bf16 %v363_v20, %v361_v19 }
 0x12e   :  { %528 = vmatprep.mubr.bf16.mxu0 %v367_v22 }
 0x12f   :  { %529 = vmatmul.mubr.bf16.vlgmr.msra.gmra.mxu0 %v366_v23 }
 0x1ef   :  { %v631_v24 = vpop.f32.mrf.mxu0 }
 0x1f1   :  { %v632_v25 = vpop.f32.mrf.mxu0 }
 0x1f2   :  { %v633_v26 = vadd.f32 %v632_v25, %v631_v24 }
 0x1f3   :  { %v634_v27 = vpop.f32.mrf.mxu0 }
 0x1f4   :  { %546 = vst [vmem:[#allocation8] sm:$0xff] %v633_v26 }
 0x1f5   :  { %v635_v28 = vpop.f32.mrf.mxu0 }
 0x1f6   :  { %v636_v29 = vadd.f32 %v635_v28, %v634_v27 }
 0x1f8   :  { %547 = vst [vmem:[#allocation8 + $0x8] sm:$0xff] %v636_v29 }
 0x1f9   :  { %779 = shalt.err (!%p776_p0)
}
 0x1fa   :  { %s802_s28 = smov 128   ;;  %s803_s29 = smov 8  }
 0x1fb   :  { %559 = dma.vmem_to_hbm [thread:$0]  %s554_s26, 256, %s839_s3, [#allocation5], %s802_s28, %s802_s28, %s803_s29  }
 0x1fc   :  { %792 = dma.done.wait [#allocation5], 256  }
 0x1fd   :  { %793 = vsyncadd [#allocation5], 4294967040 }
 0x1fe   :  { %563 = vsyncpa [#allocation4], 1 }
 0x1ff   :  { %564 = vsyncpa [#allocation7], 1 }
 0x200   :  { %565 = vsyncpa [#allocation5], 1 }

</bundles_post_ra>
